<compile_context>
chip_gen: v7x
topology: tpu7x:2x2x1
jax: 0.10.0
libtpu: 0.0.40
codegen_flags: <defaults>
</compile_context>

<pallas_src>
import functools

import jax
import jax.numpy as jnp
from jax.experimental import pallas as pl
from jax.experimental.pallas import tpu as pltpu


# ----------------------------------------------------------------------------
# Pallas kernel: full AttentionLSTM forward for one tile of queries
# ----------------------------------------------------------------------------
def _attn_lstm_kernel(q_ref, s_ref, wih_ref, whh_ref, b_ref, out_ref, *,
                      unrolling_steps, d):
    q = q_ref[...]          # (TB, D)   query embeddings (tile)
    s = s_ref[...]          # (S,  D)   support embeddings (full set)
    wih = wih_ref[...]      # (D, 4D)   W_ih^T
    whh = whh_ref[...]      # (D, 4D)   W_hh^T
    b = b_ref[...]          # (1, 4D)   b_ih + b_hh

    # Loop-invariant: input contribution to the LSTM gates (hoisted).
    x_gates = jnp.dot(q, wih, preferred_element_type=jnp.float32) + b   # (TB, 4D)

    h_hat = jnp.zeros_like(q)
    c = jnp.zeros_like(q)

    def sigmoid(x):
        # sigmoid(x) = 0.5 * (tanh(x/2) + 1): single EUP tanh + VPU fma,
        # avoids exp + divide.  Exact identity, no accuracy loss.
        return 0.5 * (jnp.tanh(0.5 * x) + 1.0)

    # unrolling_steps is a small static int -> fully unrolled trace.
    for _ in range(unrolling_steps):
        h = h_hat + q                                                    # (TB, D)

        # attentions = softmax(h @ support^T, axis=-1)
        att = jax.lax.dot_general(h, s, (((1,), (1,)), ((), ())),
                                  preferred_element_type=jnp.float32)   # (TB, S)
        att = jnp.exp(att - jnp.max(att, axis=-1, keepdims=True))
        att = att * pl.reciprocal(jnp.sum(att, axis=-1, keepdims=True),
                                  approx=True)

        readout = jnp.dot(att, s, preferred_element_type=jnp.float32)   # (TB, D)

        # LSTMCell(queries, (h + readout, c))  -- PyTorch gate order i, f, g, o
        h_prev = h + readout
        gates = x_gates + jnp.dot(h_prev, whh,
                                  preferred_element_type=jnp.float32)   # (TB, 4D)
        i_g = sigmoid(gates[:, 0 * d:1 * d])
        f_g = sigmoid(gates[:, 1 * d:2 * d])
        g_g = jnp.tanh(gates[:, 2 * d:3 * d])
        o_g = sigmoid(gates[:, 3 * d:4 * d])
        c = f_g * c + i_g * g_g
        h_hat = o_g * jnp.tanh(c)

    # Skip connection (Appendix A.2): h = h_hat + queries
    out_ref[...] = h_hat + q


# ----------------------------------------------------------------------------
# Wrapper
# ----------------------------------------------------------------------------
def attention_lstm_forward(support, queries, params, *, unrolling_steps,
                           tile_b=8):
    """support: (S, D), queries: (B, D), params: torch-layout LSTMCell weights."""
    if support.shape[-1] != queries.shape[-1]:
        raise ValueError(
            'Support and query set have different embedding dimension!')

    B, D = queries.shape
    S = support.shape[0]

    wih_t = jnp.transpose(params["w_ih"]).astype(jnp.float32)    # (D, 4D)
    whh_t = jnp.transpose(params["w_hh"]).astype(jnp.float32)    # (D, 4D)
    bias = (params["b_ih"] + params["b_hh"]).reshape(1, 4 * D).astype(jnp.float32)

    # Pad the query batch to a multiple of the (sublane-aligned) batch tile.
    b_pad = ((B + tile_b - 1) // tile_b) * tile_b
    q = queries.astype(jnp.float32)
    if b_pad != B:
        q = jnp.pad(q, ((0, b_pad - B), (0, 0)))

    out = pl.pallas_call(
        functools.partial(_attn_lstm_kernel,
                          unrolling_steps=unrolling_steps, d=D),
        out_shape=jax.ShapeDtypeStruct((b_pad, D), jnp.float32),
        grid=(b_pad // tile_b,),
        in_specs=[
            pl.BlockSpec((tile_b, D), lambda i: (i, 0)),     # queries tile
            pl.BlockSpec((S, D), lambda i: (0, 0)),          # support (resident)
            pl.BlockSpec((D, 4 * D), lambda i: (0, 0)),      # W_ih^T  (resident)
            pl.BlockSpec((D, 4 * D), lambda i: (0, 0)),      # W_hh^T  (resident)
            pl.BlockSpec((1, 4 * D), lambda i: (0, 0)),      # bias    (resident)
        ],
        out_specs=pl.BlockSpec((tile_b, D), lambda i: (i, 0)),
        compiler_params=pltpu.CompilerParams(
            dimension_semantics=("parallel",)),
    )(q, support.astype(jnp.float32), wih_t, whh_t, bias)
    return out[:B]


# ----------------------------------------------------------------------------
# Pure-JAX reference (for a numerical sanity check)
# ----------------------------------------------------------------------------
def attention_lstm_reference(support, queries, params, unrolling_steps):
    hp = jax.lax.Precision.HIGHEST
    D = queries.shape[1]
    wih_t = params["w_ih"].T
    whh_t = params["w_hh"].T
    b = params["b_ih"] + params["b_hh"]
    h_hat = jnp.zeros_like(queries)
    c = jnp.zeros_like(queries)
    for _ in range(unrolling_steps):
        h = h_hat + queries
        att = jax.nn.softmax(jnp.dot(h, support.T, precision=hp), axis=1)
        readout = jnp.dot(att, support, precision=hp)
        h_prev = h + readout
        gates = (jnp.dot(queries, wih_t, precision=hp)
                 + jnp.dot(h_prev, whh_t, precision=hp) + b)
        i_g = jax.nn.sigmoid(gates[:, 0 * D:1 * D])
        f_g = jax.nn.sigmoid(gates[:, 1 * D:2 * D])
        g_g = jnp.tanh(gates[:, 2 * D:3 * D])
        o_g = jax.nn.sigmoid(gates[:, 3 * D:4 * D])
        c = f_g * c + i_g * g_g
        h_hat = o_g * jnp.tanh(c)
    return h_hat + queries


# ----------------------------------------------------------------------------
# Main
# ----------------------------------------------------------------------------
if __name__ == "__main__":
    key = jax.random.PRNGKey(0)
    k_q, k_s, k1, k2, k3, k4 = jax.random.split(key, 6)

    size = 128               # embedding / hidden dim (lane-dense)
    n_queries = 16           # query batch (2 parallel grid tiles of 8)
    n_support = 16           # support set size
    unrolling_steps = 3

    queries = jax.random.normal(k_q, (n_queries, size), jnp.float32)
    support = jax.random.normal(k_s, (n_support, size), jnp.float32)

    # PyTorch LSTMCell default init: U(-1/sqrt(hidden), 1/sqrt(hidden)).
    bound = 1.0 / (size ** 0.5)
    params = {
        "w_ih": jax.random.uniform(k1, (4 * size, size), jnp.float32, -bound, bound),
        "w_hh": jax.random.uniform(k2, (4 * size, size), jnp.float32, -bound, bound),
        "b_ih": jax.random.uniform(k3, (4 * size,), jnp.float32, -bound, bound),
        "b_hh": jax.random.uniform(k4, (4 * size,), jnp.float32, -bound, bound),
    }

    fwd = jax.jit(functools.partial(attention_lstm_forward,
                                    unrolling_steps=unrolling_steps))
    out = fwd(support, queries, params)
    jax.block_until_ready(out)

    assert out.shape == (n_queries, size), out.shape
    assert bool(jnp.all(jnp.isfinite(out)))

    ref = attention_lstm_reference(support, queries, params, unrolling_steps)
    max_err = float(jnp.max(jnp.abs(out - ref)))
    assert max_err < 5e-2, f"max abs error vs reference: {max_err}"

    print("KERNEL_OK")
</pallas_src>

<mosaic_0001>
module attributes {stable_mosaic.version = 11 : i64} {
  func.func @_attn_lstm_kernel(%arg0: i32, %arg1: memref<8x128xf32, #tpu.memory_space<vmem>>, %arg2: memref<16x128xf32, #tpu.memory_space<vmem>>, %arg3: memref<128x512xf32, #tpu.memory_space<vmem>>, %arg4: memref<128x512xf32, #tpu.memory_space<vmem>>, %arg5: memref<1x512xf32, #tpu.memory_space<vmem>>, %arg6: memref<8x128xf32, #tpu.memory_space<vmem>>) attributes {dimension_semantics = [#tpu.dimension_semantics<parallel>], iteration_bounds = array<i64: 2>, scalar_prefetch = 0 : i64, scratch_operands = 0 : i64, tpu.core_type = #tpu.core_type<tc>, window_params = [{transform_indices = @transform_0, window_bounds = array<i64: 8, 128>}, {pipeline_mode = #tpu.pipeline_mode<synchronous>, transform_indices = @transform_1, window_bounds = array<i64: 16, 128>}, {pipeline_mode = #tpu.pipeline_mode<synchronous>, transform_indices = @transform_2, window_bounds = array<i64: 128, 512>}, {pipeline_mode = #tpu.pipeline_mode<synchronous>, transform_indices = @transform_3, window_bounds = array<i64: 128, 512>}, {pipeline_mode = #tpu.pipeline_mode<synchronous>, transform_indices = @transform_4, window_bounds = array<i64: 1, 512>}, {transform_indices = @transform_5, window_bounds = array<i64: 8, 128>}]} {
    %c0 = arith.constant 0 : index
    %c0_0 = arith.constant 0 : index
    %0 = vector.load %arg1[%c0, %c0_0] : memref<8x128xf32, #tpu.memory_space<vmem>>, vector<8x128xf32>
    %c0_1 = arith.constant 0 : index
    %c0_2 = arith.constant 0 : index
    %1 = vector.load %arg2[%c0_1, %c0_2] : memref<16x128xf32, #tpu.memory_space<vmem>>, vector<16x128xf32>
    %c0_3 = arith.constant 0 : index
    %c0_4 = arith.constant 0 : index
    %2 = vector.load %arg3[%c0_3, %c0_4] : memref<128x512xf32, #tpu.memory_space<vmem>>, vector<128x512xf32>
    %c0_5 = arith.constant 0 : index
    %c0_6 = arith.constant 0 : index
    %3 = vector.load %arg4[%c0_5, %c0_6] : memref<128x512xf32, #tpu.memory_space<vmem>>, vector<128x512xf32>
    %c0_7 = arith.constant 0 : index
    %c0_8 = arith.constant 0 : index
    %4 = vector.load %arg5[%c0_7, %c0_8] : memref<1x512xf32, #tpu.memory_space<vmem>>, vector<1x512xf32>
    %cst = arith.constant dense<0.000000e+00> : vector<8x512xf32>
    %5 = tpu.matmul %0, %2, %cst {dimension_numbers = #tpu.dot_dimension_numbers<[1], [0], [0], [1], [0, 0, 1, 1], [], []>} : vector<8x128xf32>, vector<128x512xf32>, vector<8x512xf32> -> vector<8x512xf32>
    %6 = vector.broadcast %4 : vector<1x512xf32> to vector<8x512xf32>
    %7 = arith.addf %5, %6 : vector<8x512xf32>
    %cst_9 = arith.constant 0.000000e+00 : f32
    %8 = vector.broadcast %cst_9 : f32 to vector<8x128xf32>
    %cst_10 = arith.constant 0.000000e+00 : f32
    %9 = vector.broadcast %cst_10 : f32 to vector<8x128xf32>
    %10 = arith.addf %8, %0 : vector<8x128xf32>
    %cst_11 = arith.constant dense<0.000000e+00> : vector<8x16xf32>
    %11 = tpu.matmul %10, %1, %cst_11 {dimension_numbers = #tpu.dot_dimension_numbers<[1], [1], [0], [0], [0, 0, 1, 0], [], []>} : vector<8x128xf32>, vector<16x128xf32>, vector<8x16xf32> -> vector<8x16xf32>
    %cst_12 = arith.constant dense<0xFF800000> : vector<8xf32>
    %12 = vector.multi_reduction <maximumf>, %11, %cst_12 [1] : vector<8x16xf32> to vector<8xf32>
    %13 = vector.shape_cast %12 : vector<8xf32> to vector<8x1xf32>
    %14 = vector.broadcast %13 : vector<8x1xf32> to vector<8x16xf32>
    %15 = arith.subf %11, %14 : vector<8x16xf32>
    %16 = math.exp %15 : vector<8x16xf32>
    %cst_13 = arith.constant dense<0.000000e+00> : vector<8xf32>
    %17 = vector.multi_reduction <add>, %16, %cst_13 [1] : vector<8x16xf32> to vector<8xf32>
    %18 = vector.shape_cast %17 : vector<8xf32> to vector<8x1xf32>
    %19 = tpu.reciprocal %18 {approx = true} : vector<8x1xf32> -> vector<8x1xf32>
    %20 = vector.broadcast %19 : vector<8x1xf32> to vector<8x16xf32>
    %21 = arith.mulf %16, %20 : vector<8x16xf32>
    %cst_14 = arith.constant dense<0.000000e+00> : vector<8x128xf32>
    %22 = tpu.matmul %21, %1, %cst_14 {dimension_numbers = #tpu.dot_dimension_numbers<[1], [0], [0], [1], [0, 0, 1, 1], [], []>} : vector<8x16xf32>, vector<16x128xf32>, vector<8x128xf32> -> vector<8x128xf32>
    %23 = arith.addf %10, %22 : vector<8x128xf32>
    %cst_15 = arith.constant dense<0.000000e+00> : vector<8x512xf32>
    %24 = tpu.matmul %23, %3, %cst_15 {dimension_numbers = #tpu.dot_dimension_numbers<[1], [0], [0], [1], [0, 0, 1, 1], [], []>} : vector<8x128xf32>, vector<128x512xf32>, vector<8x512xf32> -> vector<8x512xf32>
    %25 = arith.addf %7, %24 : vector<8x512xf32>
    %26 = vector.extract_strided_slice %25 {offsets = [0, 0], sizes = [8, 128], strides = [1, 1]} : vector<8x512xf32> to vector<8x128xf32>
    %cst_16 = arith.constant 5.000000e-01 : f32
    %27 = vector.broadcast %cst_16 : f32 to vector<8x128xf32>
    %28 = arith.mulf %27, %26 : vector<8x128xf32>
    %29 = math.tanh %28 : vector<8x128xf32>
    %cst_17 = arith.constant 1.000000e+00 : f32
    %30 = vector.broadcast %cst_17 : f32 to vector<8x128xf32>
    %31 = arith.addf %29, %30 : vector<8x128xf32>
    %cst_18 = arith.constant 5.000000e-01 : f32
    %32 = vector.broadcast %cst_18 : f32 to vector<8x128xf32>
    %33 = arith.mulf %32, %31 : vector<8x128xf32>
    %34 = vector.extract_strided_slice %25 {offsets = [0, 128], sizes = [8, 128], strides = [1, 1]} : vector<8x512xf32> to vector<8x128xf32>
    %cst_19 = arith.constant 5.000000e-01 : f32
    %35 = vector.broadcast %cst_19 : f32 to vector<8x128xf32>
    %36 = arith.mulf %35, %34 : vector<8x128xf32>
    %37 = math.tanh %36 : vector<8x128xf32>
    %cst_20 = arith.constant 1.000000e+00 : f32
    %38 = vector.broadcast %cst_20 : f32 to vector<8x128xf32>
    %39 = arith.addf %37, %38 : vector<8x128xf32>
    %cst_21 = arith.constant 5.000000e-01 : f32
    %40 = vector.broadcast %cst_21 : f32 to vector<8x128xf32>
    %41 = arith.mulf %40, %39 : vector<8x128xf32>
    %42 = vector.extract_strided_slice %25 {offsets = [0, 256], sizes = [8, 128], strides = [1, 1]} : vector<8x512xf32> to vector<8x128xf32>
    %43 = math.tanh %42 : vector<8x128xf32>
    %44 = vector.extract_strided_slice %25 {offsets = [0, 384], sizes = [8, 128], strides = [1, 1]} : vector<8x512xf32> to vector<8x128xf32>
    %cst_22 = arith.constant 5.000000e-01 : f32
    %45 = vector.broadcast %cst_22 : f32 to vector<8x128xf32>
    %46 = arith.mulf %45, %44 : vector<8x128xf32>
    %47 = math.tanh %46 : vector<8x128xf32>
    %cst_23 = arith.constant 1.000000e+00 : f32
    %48 = vector.broadcast %cst_23 : f32 to vector<8x128xf32>
    %49 = arith.addf %47, %48 : vector<8x128xf32>
    %cst_24 = arith.constant 5.000000e-01 : f32
    %50 = vector.broadcast %cst_24 : f32 to vector<8x128xf32>
    %51 = arith.mulf %50, %49 : vector<8x128xf32>
    %52 = arith.mulf %41, %9 : vector<8x128xf32>
    %53 = arith.mulf %33, %43 : vector<8x128xf32>
    %54 = arith.addf %52, %53 : vector<8x128xf32>
    %55 = math.tanh %54 : vector<8x128xf32>
    %56 = arith.mulf %51, %55 : vector<8x128xf32>
    %57 = arith.addf %56, %0 : vector<8x128xf32>
    %cst_25 = arith.constant dense<0.000000e+00> : vector<8x16xf32>
    %58 = tpu.matmul %57, %1, %cst_25 {dimension_numbers = #tpu.dot_dimension_numbers<[1], [1], [0], [0], [0, 0, 1, 0], [], []>} : vector<8x128xf32>, vector<16x128xf32>, vector<8x16xf32> -> vector<8x16xf32>
    %cst_26 = arith.constant dense<0xFF800000> : vector<8xf32>
    %59 = vector.multi_reduction <maximumf>, %58, %cst_26 [1] : vector<8x16xf32> to vector<8xf32>
    %60 = vector.shape_cast %59 : vector<8xf32> to vector<8x1xf32>
    %61 = vector.broadcast %60 : vector<8x1xf32> to vector<8x16xf32>
    %62 = arith.subf %58, %61 : vector<8x16xf32>
    %63 = math.exp %62 : vector<8x16xf32>
    %cst_27 = arith.constant dense<0.000000e+00> : vector<8xf32>
    %64 = vector.multi_reduction <add>, %63, %cst_27 [1] : vector<8x16xf32> to vector<8xf32>
    %65 = vector.shape_cast %64 : vector<8xf32> to vector<8x1xf32>
    %66 = tpu.reciprocal %65 {approx = true} : vector<8x1xf32> -> vector<8x1xf32>
    %67 = vector.broadcast %66 : vector<8x1xf32> to vector<8x16xf32>
    %68 = arith.mulf %63, %67 : vector<8x16xf32>
    %cst_28 = arith.constant dense<0.000000e+00> : vector<8x128xf32>
    %69 = tpu.matmul %68, %1, %cst_28 {dimension_numbers = #tpu.dot_dimension_numbers<[1], [0], [0], [1], [0, 0, 1, 1], [], []>} : vector<8x16xf32>, vector<16x128xf32>, vector<8x128xf32> -> vector<8x128xf32>
    %70 = arith.addf %57, %69 : vector<8x128xf32>
    %cst_29 = arith.constant dense<0.000000e+00> : vector<8x512xf32>
    %71 = tpu.matmul %70, %3, %cst_29 {dimension_numbers = #tpu.dot_dimension_numbers<[1], [0], [0], [1], [0, 0, 1, 1], [], []>} : vector<8x128xf32>, vector<128x512xf32>, vector<8x512xf32> -> vector<8x512xf32>
    %72 = arith.addf %7, %71 : vector<8x512xf32>
    %73 = vector.extract_strided_slice %72 {offsets = [0, 0], sizes = [8, 128], strides = [1, 1]} : vector<8x512xf32> to vector<8x128xf32>
    %cst_30 = arith.constant 5.000000e-01 : f32
    %74 = vector.broadcast %cst_30 : f32 to vector<8x128xf32>
    %75 = arith.mulf %74, %73 : vector<8x128xf32>
    %76 = math.tanh %75 : vector<8x128xf32>
    %cst_31 = arith.constant 1.000000e+00 : f32
    %77 = vector.broadcast %cst_31 : f32 to vector<8x128xf32>
    %78 = arith.addf %76, %77 : vector<8x128xf32>
    %cst_32 = arith.constant 5.000000e-01 : f32
    %79 = vector.broadcast %cst_32 : f32 to vector<8x128xf32>
    %80 = arith.mulf %79, %78 : vector<8x128xf32>
    %81 = vector.extract_strided_slice %72 {offsets = [0, 128], sizes = [8, 128], strides = [1, 1]} : vector<8x512xf32> to vector<8x128xf32>
    %cst_33 = arith.constant 5.000000e-01 : f32
    %82 = vector.broadcast %cst_33 : f32 to vector<8x128xf32>
    %83 = arith.mulf %82, %81 : vector<8x128xf32>
    %84 = math.tanh %83 : vector<8x128xf32>
    %cst_34 = arith.constant 1.000000e+00 : f32
    %85 = vector.broadcast %cst_34 : f32 to vector<8x128xf32>
    %86 = arith.addf %84, %85 : vector<8x128xf32>
    %cst_35 = arith.constant 5.000000e-01 : f32
    %87 = vector.broadcast %cst_35 : f32 to vector<8x128xf32>
    %88 = arith.mulf %87, %86 : vector<8x128xf32>
    %89 = vector.extract_strided_slice %72 {offsets = [0, 256], sizes = [8, 128], strides = [1, 1]} : vector<8x512xf32> to vector<8x128xf32>
    %90 = math.tanh %89 : vector<8x128xf32>
    %91 = vector.extract_strided_slice %72 {offsets = [0, 384], sizes = [8, 128], strides = [1, 1]} : vector<8x512xf32> to vector<8x128xf32>
    %cst_36 = arith.constant 5.000000e-01 : f32
    %92 = vector.broadcast %cst_36 : f32 to vector<8x128xf32>
    %93 = arith.mulf %92, %91 : vector<8x128xf32>
    %94 = math.tanh %93 : vector<8x128xf32>
    %cst_37 = arith.constant 1.000000e+00 : f32
    %95 = vector.broadcast %cst_37 : f32 to vector<8x128xf32>
    %96 = arith.addf %94, %95 : vector<8x128xf32>
    %cst_38 = arith.constant 5.000000e-01 : f32
    %97 = vector.broadcast %cst_38 : f32 to vector<8x128xf32>
    %98 = arith.mulf %97, %96 : vector<8x128xf32>
    %99 = arith.mulf %88, %54 : vector<8x128xf32>
    %100 = arith.mulf %80, %90 : vector<8x128xf32>
    %101 = arith.addf %99, %100 : vector<8x128xf32>
    %102 = math.tanh %101 : vector<8x128xf32>
    %103 = arith.mulf %98, %102 : vector<8x128xf32>
    %104 = arith.addf %103, %0 : vector<8x128xf32>
    %cst_39 = arith.constant dense<0.000000e+00> : vector<8x16xf32>
    %105 = tpu.matmul %104, %1, %cst_39 {dimension_numbers = #tpu.dot_dimension_numbers<[1], [1], [0], [0], [0, 0, 1, 0], [], []>} : vector<8x128xf32>, vector<16x128xf32>, vector<8x16xf32> -> vector<8x16xf32>
    %cst_40 = arith.constant dense<0xFF800000> : vector<8xf32>
    %106 = vector.multi_reduction <maximumf>, %105, %cst_40 [1] : vector<8x16xf32> to vector<8xf32>
    %107 = vector.shape_cast %106 : vector<8xf32> to vector<8x1xf32>
    %108 = vector.broadcast %107 : vector<8x1xf32> to vector<8x16xf32>
    %109 = arith.subf %105, %108 : vector<8x16xf32>
    %110 = math.exp %109 : vector<8x16xf32>
    %cst_41 = arith.constant dense<0.000000e+00> : vector<8xf32>
    %111 = vector.multi_reduction <add>, %110, %cst_41 [1] : vector<8x16xf32> to vector<8xf32>
    %112 = vector.shape_cast %111 : vector<8xf32> to vector<8x1xf32>
    %113 = tpu.reciprocal %112 {approx = true} : vector<8x1xf32> -> vector<8x1xf32>
    %114 = vector.broadcast %113 : vector<8x1xf32> to vector<8x16xf32>
    %115 = arith.mulf %110, %114 : vector<8x16xf32>
    %cst_42 = arith.constant dense<0.000000e+00> : vector<8x128xf32>
    %116 = tpu.matmul %115, %1, %cst_42 {dimension_numbers = #tpu.dot_dimension_numbers<[1], [0], [0], [1], [0, 0, 1, 1], [], []>} : vector<8x16xf32>, vector<16x128xf32>, vector<8x128xf32> -> vector<8x128xf32>
    %117 = arith.addf %104, %116 : vector<8x128xf32>
    %cst_43 = arith.constant dense<0.000000e+00> : vector<8x512xf32>
    %118 = tpu.matmul %117, %3, %cst_43 {dimension_numbers = #tpu.dot_dimension_numbers<[1], [0], [0], [1], [0, 0, 1, 1], [], []>} : vector<8x128xf32>, vector<128x512xf32>, vector<8x512xf32> -> vector<8x512xf32>
    %119 = arith.addf %7, %118 : vector<8x512xf32>
    %120 = vector.extract_strided_slice %119 {offsets = [0, 0], sizes = [8, 128], strides = [1, 1]} : vector<8x512xf32> to vector<8x128xf32>
    %cst_44 = arith.constant 5.000000e-01 : f32
    %121 = vector.broadcast %cst_44 : f32 to vector<8x128xf32>
    %122 = arith.mulf %121, %120 : vector<8x128xf32>
    %123 = math.tanh %122 : vector<8x128xf32>
    %cst_45 = arith.constant 1.000000e+00 : f32
    %124 = vector.broadcast %cst_45 : f32 to vector<8x128xf32>
    %125 = arith.addf %123, %124 : vector<8x128xf32>
    %cst_46 = arith.constant 5.000000e-01 : f32
    %126 = vector.broadcast %cst_46 : f32 to vector<8x128xf32>
    %127 = arith.mulf %126, %125 : vector<8x128xf32>
    %128 = vector.extract_strided_slice %119 {offsets = [0, 128], sizes = [8, 128], strides = [1, 1]} : vector<8x512xf32> to vector<8x128xf32>
    %cst_47 = arith.constant 5.000000e-01 : f32
    %129 = vector.broadcast %cst_47 : f32 to vector<8x128xf32>
    %130 = arith.mulf %129, %128 : vector<8x128xf32>
    %131 = math.tanh %130 : vector<8x128xf32>
    %cst_48 = arith.constant 1.000000e+00 : f32
    %132 = vector.broadcast %cst_48 : f32 to vector<8x128xf32>
    %133 = arith.addf %131, %132 : vector<8x128xf32>
    %cst_49 = arith.constant 5.000000e-01 : f32
    %134 = vector.broadcast %cst_49 : f32 to vector<8x128xf32>
    %135 = arith.mulf %134, %133 : vector<8x128xf32>
    %136 = vector.extract_strided_slice %119 {offsets = [0, 256], sizes = [8, 128], strides = [1, 1]} : vector<8x512xf32> to vector<8x128xf32>
    %137 = math.tanh %136 : vector<8x128xf32>
    %138 = vector.extract_strided_slice %119 {offsets = [0, 384], sizes = [8, 128], strides = [1, 1]} : vector<8x512xf32> to vector<8x128xf32>
    %cst_50 = arith.constant 5.000000e-01 : f32
    %139 = vector.broadcast %cst_50 : f32 to vector<8x128xf32>
    %140 = arith.mulf %139, %138 : vector<8x128xf32>
    %141 = math.tanh %140 : vector<8x128xf32>
    %cst_51 = arith.constant 1.000000e+00 : f32
    %142 = vector.broadcast %cst_51 : f32 to vector<8x128xf32>
    %143 = arith.addf %141, %142 : vector<8x128xf32>
    %cst_52 = arith.constant 5.000000e-01 : f32
    %144 = vector.broadcast %cst_52 : f32 to vector<8x128xf32>
    %145 = arith.mulf %144, %143 : vector<8x128xf32>
    %146 = arith.mulf %135, %101 : vector<8x128xf32>
    %147 = arith.mulf %127, %137 : vector<8x128xf32>
    %148 = arith.addf %146, %147 : vector<8x128xf32>
    %149 = math.tanh %148 : vector<8x128xf32>
    %150 = arith.mulf %145, %149 : vector<8x128xf32>
    %151 = arith.addf %150, %0 : vector<8x128xf32>
    %c0_53 = arith.constant 0 : index
    %c0_54 = arith.constant 0 : index
    %152 = vector.load %arg6[%c0_53, %c0_54] : memref<8x128xf32, #tpu.memory_space<vmem>>, vector<8x128xf32>
    tpu.vector_store %arg6[%c0_53, %c0_54], %151 {strides = array<i32>} : memref<8x128xf32, #tpu.memory_space<vmem>>, vector<8x128xf32>,
    return
  }
  func.func @transform_0(%arg0: i32) -> (i32, i32) {
    %c0_i32 = arith.constant 0 : i32
    %c0_i32_0 = arith.constant 0 : i32
    return %arg0, %c0_i32 : i32, i32
  }
  func.func @transform_1(%arg0: i32) -> (i32, i32) {
    %c0_i32 = arith.constant 0 : i32
    %c0_i32_0 = arith.constant 0 : i32
    %c0_i32_1 = arith.constant 0 : i32
    return %c0_i32, %c0_i32_0 : i32, i32
  }
  func.func @transform_2(%arg0: i32) -> (i32, i32) {
    %c0_i32 = arith.constant 0 : i32
    %c0_i32_0 = arith.constant 0 : i32
    %c0_i32_1 = arith.constant 0 : i32
    return %c0_i32, %c0_i32_0 : i32, i32
  }
  func.func @transform_3(%arg0: i32) -> (i32, i32) {
    %c0_i32 = arith.constant 0 : i32
    %c0_i32_0 = arith.constant 0 : i32
    %c0_i32_1 = arith.constant 0 : i32
    return %c0_i32, %c0_i32_0 : i32, i32
  }
  func.func @transform_4(%arg0: i32) -> (i32, i32) {
    %c0_i32 = arith.constant 0 : i32
    %c0_i32_0 = arith.constant 0 : i32
    %c0_i32_1 = arith.constant 0 : i32
    return %c0_i32, %c0_i32_0 : i32, i32
  }
  func.func @transform_5(%arg0: i32) -> (i32, i32) {
    %c0_i32 = arith.constant 0 : i32
    %c0_i32_0 = arith.constant 0 : i32
    return %arg0, %c0_i32 : i32, i32
  }
}

</mosaic_0001>

<bundles_post_ra>
// kernel: attention_lstm_forward.1
= control target key start
LH: loop header
LB: loop body
LE: loop exit
PB: predicated region body
PF: predicated region fallthrough
CT: control target
= control target key end

     0   :  { %10 = vsyncpa [#allocation3], 0  ;;  %s2823_s0 = inlined_call_operand.vmem [shape: f32[16,128], index: 0, kind: input, shape index: {}]   ;;  %s2824_s1 = inlined_call_operand.vmem [shape: f32[16,128], index: 1, kind: input, shape index: {}]   ;;  %s2825_s2 = inlined_call_operand.vmem [shape: f32[128,512], index: 2, kind: input, shape index: {}]   ;;  %s2826_s3 = inlined_call_operand.vmem [shape: f32[128,512], index: 3, kind: input, shape index: {}]   ;;  %s2827_s4 = inlined_call_operand.vmem [shape: f32[1,512], index: 4, kind: input, shape index: {}]   ;;  %s2828_s5 = inlined_call_operand.hbm [shape: f32[16,128], index: 5, kind: output, shape index: {}]  }
   0x1   :  { %12 = vsyncpa [#allocation3 + $0x1], 0  ;;  %s2080_s18 = smov 0   ;;  %s2082_s19 = smov 0  }
   0x2   :  { %s2084_s20 = smov 0   ;;  %s2086_s21 = smov 0  }
   0x3 LB: > { %s2101_s22 = sadd.s32 4294967295, %s2044_s21   ;;  %s1551_s23 = sadd.s32 4294967294, %s2044_s21   ;;  %s2044_s21 = sphi %s2086_s21, %s2834_s21   ;;  %s2040_s20 = sphi %s2084_s20, %s2833_s20   ;;  %s2036_s19 = sphi %s2082_s19, %s2832_s19   ;;  %s2032_s18 = sphi %s2080_s18, %s2831_s18  }
   0x4   : > { %s2105_s24 = sadd.s32 1, %s2044_s21   ;;  %s135_s25 = sadd.s32 1, %s2040_s20 }
   0x5   : > { %s132_s26 = ssub.s32 %s2044_s21, %s2105_s24  ;;  %p145_p0 = scmp.ne.s32.totalorder %s2040_s20, %s2036_s19 }
   0x6   : > { %p133_p1 = scmp.eq.s32.totalorder %s132_s26, 0  ;;  %p146_p2 = scmp.eq.s32.totalorder %s2101_s22, 1 }
   0x7   : > { %p151_p3 = scmp.ne.s32.totalorder %s2036_s19, %s2032_s18  ;;  %p152_p4 = scmp.eq.s32.totalorder %s1551_s23, 1 }
   0x8   : > { %s2116_s27 = scalar_select %p133_p1, %s2040_s20, %s135_s25  }
   0x9   : > { %p2118_p5 = por %p146_p2, %p145_p0  ;;  %p2122_p6 = por %p152_p4, %p151_p3 }
   0xa   : > { %p1554_p7 = scmp.ge.s32.totalorder %s2044_s21, 1  ;;  %p189_p8 = scmp.lt.s32.totalorder %s2044_s21, 3 }
   0xc   : > { %p190_p9 = pnand %p1554_p7, %p189_p8 }
   0xd   : > { %v224_v0 = vld [vmem:[%s2825_s2 + $0x8] sm:$0xff] (!%p190_p9)  ;;  %v223_v2 = vld [vmem:[%s2825_s2] sm:$0xff] (!%p190_p9)  ;;  %v2046_v7 = vmov (!%p190_p9), 0.0   ;;  %p216_p10 = scmp.lt.s32.totalorder (!%p190_p9), %s2101_s22, 1  ;;  %v2047_v50 = vmov (!%p190_p9), 0.0|0.0   ;;  %vm2048_vm0 = vmmov (!%p190_p9), 0  }
   0xe   : > { %193 = sbr.rel (%p190_p9) target bundleno = 3049 (0xbe9), region = 40  ;;  %v228_v1 = vld [vmem:[%s2825_s2 + $0x28] sm:$0xff] (!%p190_p9)  ;;  %v227_v4 = vld [vmem:[%s2825_s2 + $0x20] sm:$0xff] (!%p190_p9)  ;;  %437 = vmatprep.mubr.f32.mxu0 (!%p190_p9), %v2046_v7  ;;  %508 = vmatprep.mubr.f32.mxu1 (!%p190_p9), %v2046_v7  ;;  %vm586_vm1 = vcmask (!%p190_p9), 130048   ;;  %v226_v59 = vld [vmem:[%s2825_s2 + $0x18] sm:$0xff] (!%p190_p9)  ;;  %s213_s16 = sand.u32 (!%p190_p9), 1, %s2036_s19  }
   0xf   : > { %v1624_v3 = vpack.c.bf16 (!%p190_p9), %v228_v1, %v224_v0  ;;  %v232_v5 = vld [vmem:[%s2825_s2 + $0x48] sm:$0xff] (!%p190_p9)  ;;  %v1626_v8 = vpack.c.bf16 (!%p190_p9), %v227_v4, %v223_v2  ;;  %v231_v10 = vld [vmem:[%s2825_s2 + $0x40] sm:$0xff] (!%p190_p9)  ;;  %v230_v60 = vld [vmem:[%s2825_s2 + $0x38] sm:$0xff] (!%p190_p9)  ;;  %s1561_s23 = sshll.u32 (!%p190_p9), %s2101_s22, 7  ;;  %s1479_s8 = scalar_lea.sflag (!%p190_p9), [#allocation3], %s213_s16 }
  0x10   : > { %v236_v6 = vld [vmem:[%s2825_s2 + $0x68] sm:$0xff] (!%p190_p9)  ;;  %v235_v11 = vld [vmem:[%s2825_s2 + $0x60] sm:$0xff] (!%p190_p9)  ;;  %v225_v61 = vld [vmem:[%s2825_s2 + $0x10] sm:$0xff] (!%p190_p9)  ;;  %v1656_v62 = vpack.c.bf16 (!%p190_p9), %v230_v60, %v226_v59  ;;  %s2781_s7 = scalar_lea.hbm (!%p190_p9), %s2828_s5, %s1561_s23 }
  0x11   : > { %v1628_v9 = vpack.c.bf16 (!%p190_p9), %v236_v6, %v232_v5  ;;  %v240_v12 = vld [vmem:[%s2825_s2 + $0x88] sm:$0xff] (!%p190_p9)  ;;  %1625 = vmatprep.subr.bf16.mxu0 (!%p190_p9), %v1624_v3  ;;  %v1630_v14 = vpack.c.bf16 (!%p190_p9), %v235_v11, %v231_v10  ;;  %v239_v16 = vld [vmem:[%s2825_s2 + $0x80] sm:$0xff] (!%p190_p9)  ;;  %v229_v63 = vld [vmem:[%s2825_s2 + $0x30] sm:$0xff] (!%p190_p9) }
  0x12   : > { %v244_v13 = vld [vmem:[%s2825_s2 + $0xa8] sm:$0xff] (!%p190_p9)  ;;  %1627 = vmatpush1.bf16.msra.mxu0 (!%p190_p9), %v1626_v8  ;;  %v243_v17 = vld [vmem:[%s2825_s2 + $0xa0] sm:$0xff] (!%p190_p9)  ;;  %v234_v0 = vld [vmem:[%s2825_s2 + $0x58] sm:$0xff] (!%p190_p9)  ;;  %v1658_v2 = vpack.c.bf16 (!%p190_p9), %v229_v63, %v225_v61  ;;  %1657 = vmatprep.subr.bf16.mxu1 (!%p190_p9), %v1656_v62 }
  0x13   : > { %1629 = vmatprep.subr.bf16.mxu0 (!%p190_p9), %v1628_v9  ;;  %v1632_v15 = vpack.c.bf16 (!%p190_p9), %v244_v13, %v240_v12  ;;  %v248_v18 = vld [vmem:[%s2825_s2 + $0xc8] sm:$0xff] (!%p190_p9)  ;;  %v1634_v20 = vpack.c.bf16 (!%p190_p9), %v243_v17, %v239_v16  ;;  %v247_v22 = vld [vmem:[%s2825_s2 + $0xc0] sm:$0xff] (!%p190_p9)  ;;  %v238_v1 = vld [vmem:[%s2825_s2 + $0x78] sm:$0xff] (!%p190_p9) }
  0x14   : > { %v252_v19 = vld [vmem:[%s2825_s2 + $0xe8] sm:$0xff] (!%p190_p9)  ;;  %v251_v23 = vld [vmem:[%s2825_s2 + $0xe0] sm:$0xff] (!%p190_p9)  ;;  %v1660_v3 = vpack.c.bf16 (!%p190_p9), %v238_v1, %v234_v0  ;;  %v233_v4 = vld [vmem:[%s2825_s2 + $0x50] sm:$0xff] (!%p190_p9)  ;;  %1659 = vmatpush1.bf16.msra.mxu1 (!%p190_p9), %v1658_v2 }
  0x15   : > { %v1636_v21 = vpack.c.bf16 %v252_v19, %v248_v18  ;;  %v256_v24 = vld [vmem:[%s2825_s2 + $0x108] sm:$0xff]  ;;  %v1638_v26 = vpack.c.bf16 %v251_v23, %v247_v22  ;;  %v255_v28 = vld [vmem:[%s2825_s2 + $0x100] sm:$0xff]  ;;  %s217_s17 = scalar_select %p216_p10, %s2101_s22, 1  ;;  %v237_v5 = vld [vmem:[%s2825_s2 + $0x70] sm:$0xff] }
  0x16   : > { %1631 = vmatpush1.bf16.msra.mxu0 %v1630_v14  ;;  %v260_v25 = vld [vmem:[%s2825_s2 + $0x128] sm:$0xff]  ;;  %v259_v29 = vld [vmem:[%s2825_s2 + $0x120] sm:$0xff]  ;;  %v242_v6 = vld [vmem:[%s2825_s2 + $0x98] sm:$0xff]  ;;  %v1662_v9 = vpack.c.bf16 %v237_v5, %v233_v4  ;;  %1661 = vmatprep.subr.bf16.mxu1 %v1660_v3  ;;  %s2049_s22 = smov [#allocation2]  }
  0x17   : > { %1633 = vmatprep.subr.bf16.mxu0 %v1632_v15  ;;  %v1640_v27 = vpack.c.bf16 %v260_v25, %v256_v24  ;;  %v264_v30 = vld [vmem:[%s2825_s2 + $0x148] sm:$0xff]  ;;  %v1642_v32 = vpack.c.bf16 %v259_v29, %v255_v28  ;;  %v263_v34 = vld [vmem:[%s2825_s2 + $0x140] sm:$0xff]  ;;  %s1556_s6 = sshll.u32 %s217_s17, 3  ;;  %v246_v8 = vld [vmem:[%s2825_s2 + $0xb8] sm:$0xff]  ;;  %s1555_s17 = sshll.u32 %s213_s16, 3 }
  0x18   : > { %v268_v31 = vld [vmem:[%s2825_s2 + $0x168] sm:$0xff]  ;;  %v267_v35 = vld [vmem:[%s2825_s2 + $0x160] sm:$0xff]  ;;  %s219_s9 = scalar_lea.vmem %s2823_s0, %s1556_s6  ;;  %v1664_v10 = vpack.c.bf16 %v246_v8, %v242_v6  ;;  %v241_v11 = vld [vmem:[%s2825_s2 + $0x90] sm:$0xff]  ;;  %1663 = vmatpush1.bf16.msra.mxu1 %v1662_v9  ;;  %s215_s25 = scalar_lea.vmem [#allocation2], %s1555_s17 }
  0x19   : > { %v1644_v33 = vpack.c.bf16 %v268_v31, %v264_v30  ;;  %v272_v36 = vld [vmem:[%s2825_s2 + $0x188] sm:$0xff]  ;;  %v1646_v38 = vpack.c.bf16 %v267_v35, %v263_v34  ;;  %v271_v40 = vld [vmem:[%s2825_s2 + $0x180] sm:$0xff]  ;;  %v245_v12 = vld [vmem:[%s2825_s2 + $0xb0] sm:$0xff]  ;;  %s1492_s26 = sshll.u32 %s215_s25, 4  ;;  %s1986_s10 = sshll.u32 %s2049_s22, 4  ;;  %s2783_s26 = int_to_ptr.vmem [resolvable:$true] %s1492_s26  ;;  %s1987_s10 = int_to_ptr.vmem [resolvable:$false] %s1986_s10 }
  0x1a   : > { %1635 = vmatpush1.bf16.msra.mxu0 %v1634_v20  ;;  %v276_v37 = vld [vmem:[%s2825_s2 + $0x1a8] sm:$0xff]  ;;  %v275_v41 = vld [vmem:[%s2825_s2 + $0x1a0] sm:$0xff]  ;;  %v250_v13 = vld [vmem:[%s2825_s2 + $0xd8] sm:$0xff]  ;;  %v1666_v15 = vpack.c.bf16 %v245_v12, %v241_v11  ;;  %1665 = vmatprep.subr.bf16.mxu1 %v1664_v10  ;;  %s1988_s11 = scalar_lea.vmem %s1987_s10, 256  ;;  %p1989_p0 = scmp.lt.s32.totalorder %s2783_s26, %s1987_s10 }
  0x1b   : > { %1637 = vmatprep.subr.bf16.mxu0 %v1636_v21  ;;  %v1648_v39 = vpack.c.bf16 %v276_v37, %v272_v36  ;;  %v280_v42 = vld [vmem:[%s2825_s2 + $0x1c8] sm:$0xff]  ;;  %v1650_v44 = vpack.c.bf16 %v275_v41, %v271_v40  ;;  %v279_v46 = vld [vmem:[%s2825_s2 + $0x1c0] sm:$0xff]  ;;  %v254_v14 = vld [vmem:[%s2825_s2 + $0xf8] sm:$0xff] }
  0x1c   : > { %v284_v43 = vld [vmem:[%s2825_s2 + $0x1e8] sm:$0xff]  ;;  %v283_v47 = vld [vmem:[%s2825_s2 + $0x1e0] sm:$0xff]  ;;  %v1668_v16 = vpack.c.bf16 %v254_v14, %v250_v13  ;;  %v249_v17 = vld [vmem:[%s2825_s2 + $0xd0] sm:$0xff]  ;;  %1667 = vmatpush1.bf16.msra.mxu1 %v1666_v15 }
  0x1d   : > { %v1652_v45 = vpack.c.bf16 %v284_v43, %v280_v42  ;;  %v1654_v48 = vpack.c.bf16 %v283_v47, %v279_v46  ;;  %v2231_v49 = vld [vmem:[%s219_s9] sm:$0xff]  ;;  %v222_v52 = vld [vmem:[%s2824_s1 + $0x8] sm:$0xff]  ;;  %v253_v18 = vld [vmem:[%s2825_s2 + $0xf0] sm:$0xff]  ;;  %s1982_s9 = scalar_lea.vmem %s2783_s26, 128 }
  0x1e   : > { %1639 = vmatpush1.bf16.msra.mxu0 %v1638_v26  ;;  %v221_v51 = vld [vmem:[%s2824_s1] sm:$0xff]  ;;  %v258_v19 = vld [vmem:[%s2825_s2 + $0x118] sm:$0xff]  ;;  %v1670_v21 = vpack.c.bf16 %v253_v18, %v249_v17  ;;  %1669 = vmatprep.subr.bf16.mxu1 %v1668_v16  ;;  %v257_v23 = vld [vmem:[%s2825_s2 + $0x110] sm:$0xff]  ;;  %p1983_p11 = scmp.ne.s32.totalorder %s2783_s26, %s1982_s9  ;;  %p1990_p1 = scmp.lt.s32.totalorder %s1988_s11, %s1982_s9 }
  0x1f   : > { %1641 = vmatprep.subr.bf16.mxu0 %v1640_v27  ;;  %v2243_v53 = vpack.c.bf16 %v222_v52, %v221_v51  ;;  %v262_v20 = vld [vmem:[%s2825_s2 + $0x138] sm:$0xff]  ;;  %v261_v24 = vld [vmem:[%s2825_s2 + $0x130] sm:$0xff]  ;;  %v288_v51 = vld [vmem:[%s2826_s3 + $0x8] sm:$0xff] }
  0x20   : > { %v1672_v22 = vpack.c.bf16 %v262_v20, %v258_v19  ;;  %v266_v25 = vld [vmem:[%s2825_s2 + $0x158] sm:$0xff]  ;;  %1671 = vmatpush1.bf16.msra.mxu1 %v1670_v21  ;;  %v1674_v27 = vpack.c.bf16 %v261_v24, %v257_v23  ;;  %v265_v29 = vld [vmem:[%s2825_s2 + $0x150] sm:$0xff]  ;;  %v292_v52 = vld [vmem:[%s2826_s3 + $0x28] sm:$0xff]  ;;  %p1984_p12 = pnand %p1983_p11, %p2118_p5  ;;  %p1991_p2 = por %p1990_p1, %p1989_p0 }
  0x21   : > { %v270_v26 = vld [vmem:[%s2825_s2 + $0x178] sm:$0xff]  ;;  %v269_v30 = vld [vmem:[%s2825_s2 + $0x170] sm:$0xff] }
  0x22   : > { %1643 = vmatpush1.bf16.msra.mxu0 %v1642_v32  ;;  %1673 = vmatprep.subr.bf16.mxu1 %v1672_v22  ;;  %v1676_v28 = vpack.c.bf16 %v270_v26, %v266_v25  ;;  %v1678_v31 = vpack.c.bf16 %v269_v30, %v265_v29  ;;  %v274_v37 = vld [vmem:[%s2825_s2 + $0x198] sm:$0xff]  ;;  %v273_v40 = vld [vmem:[%s2825_s2 + $0x190] sm:$0xff]  ;;  %p1985_p13 = pneg %p1984_p12 }
  0x23   : > { %1645 = vmatprep.subr.bf16.mxu0 %v1644_v33  ;;  %v277_v41 = vld [vmem:[%s2825_s2 + $0x1b0] sm:$0xff]  ;;  %v282_v43 = vld [vmem:[%s2825_s2 + $0x1d8] sm:$0xff] }
  0x24   : > { %1675 = vmatpush1.bf16.msra.mxu1 %v1674_v27  ;;  %v1682_v42 = vpack.c.bf16 %v277_v41, %v273_v40  ;;  %v281_v46 = vld [vmem:[%s2825_s2 + $0x1d0] sm:$0xff]  ;;  %v298_v63 = vld [vmem:[%s2826_s3 + $0x58] sm:$0xff]  ;;  %v287_v41 = vld [vmem:[%s2826_s3] sm:$0xff]  ;;  %p1992_p3 = pnand %p1991_p2, %p1985_p13 }
  0x25   : > { %1677 = vmatprep.subr.bf16.mxu1 %v1676_v28  ;;  %v285_v47 = vld [vmem:[%s2825_s2 + $0x1f0] sm:$0xff]  ;;  %v302_v0 = vld [vmem:[%s2826_s3 + $0x78] sm:$0xff] }
  0x26   : > { %1647 = vmatpush1.bf16.msra.mxu0 %v1646_v38  ;;  %v278_v38 = vld [vmem:[%s2825_s2 + $0x1b8] sm:$0xff]  ;;  %v289_v60 = vld [vmem:[%s2826_s3 + $0x10] sm:$0xff]  ;;  %v2390_v1 = vpack.c.bf16 %v302_v0, %v298_v63  ;;  %v307_v63 = vld [vmem:[%s2826_s3 + $0xa0] sm:$0xff] }
  0x27   : > { %1649 = vmatprep.subr.bf16.mxu0 %v1648_v39  ;;  %v1680_v39 = vpack.c.bf16 %v278_v38, %v274_v37  ;;  %v293_v61 = vld [vmem:[%s2826_s3 + $0x30] sm:$0xff]  ;;  %v306_v5 = vld [vmem:[%s2826_s3 + $0x98] sm:$0xff]  ;;  %v312_v0 = vld [vmem:[%s2826_s3 + $0xc8] sm:$0xff] }
  0x28   : > { %1679 = vmatpush1.bf16.msra.mxu1 %v1678_v31  ;;  %v2381_v62 = vpack.c.bf16 %v293_v61, %v289_v60  ;;  %v297_v2 = vld [vmem:[%s2826_s3 + $0x50] sm:$0xff]  ;;  %v310_v6 = vld [vmem:[%s2826_s3 + $0xb8] sm:$0xff]  ;;  %v303_v61 = vld [vmem:[%s2826_s3 + $0x80] sm:$0xff] }
  0x29   : > { %1681 = vmatprep.subr.bf16.mxu1 %v1680_v39  ;;  %v301_v3 = vld [vmem:[%s2826_s3 + $0x70] sm:$0xff]  ;;  %v2408_v8 = vpack.c.bf16 %v310_v6, %v306_v5  ;;  %v314_v12 = vld [vmem:[%s2826_s3 + $0xd8] sm:$0xff]  ;;  %v311_v6 = vld [vmem:[%s2826_s3 + $0xc0] sm:$0xff] }
  0x2a   : > { %1651 = vmatpush1.bf16.msra.mxu0 %v1650_v44  ;;  %v286_v44 = vld [vmem:[%s2825_s2 + $0x1f8] sm:$0xff]  ;;  %v2400_v4 = vpack.c.bf16 %v301_v3, %v297_v2  ;;  %v305_v9 = vld [vmem:[%s2826_s3 + $0x90] sm:$0xff]  ;;  %v316_v2 = vld [vmem:[%s2826_s3 + $0xe8] sm:$0xff]  ;;  %v2552_v3 = vpack.c.bf16 %v307_v63, %v303_v61 }
  0x2b   : > { %1653 = vmatprep.subr.bf16.mxu0 %v1652_v45  ;;  %v1684_v45 = vpack.c.bf16 %v286_v44, %v282_v43  ;;  %v309_v10 = vld [vmem:[%s2826_s3 + $0xb0] sm:$0xff]  ;;  %v318_v13 = vld [vmem:[%s2826_s3 + $0xf8] sm:$0xff]  ;;  %v296_v43 = vld [vmem:[%s2826_s3 + $0x48] sm:$0xff]  ;;  %v2555_v5 = vpack.c.bf16 %v316_v2, %v312_v0  ;;  %v353_v2 = vlaneseq }
  0x2c   : > { %1683 = vmatpush1.bf16.msra.mxu1 %v1682_v42  ;;  %v2418_v11 = vpack.c.bf16 %v309_v10, %v305_v9  ;;  %v2426_v14 = vpack.c.bf16 %v318_v13, %v314_v12  ;;  %v313_v15 = vld [vmem:[%s2826_s3 + $0xd0] sm:$0xff]  ;;  %v322_v18 = vld [vmem:[%s2826_s3 + $0x118] sm:$0xff]  ;;  %v291_v42 = vld [vmem:[%s2826_s3 + $0x20] sm:$0xff] }
  0x2d   : > { %1685 = vmatprep.subr.bf16.mxu1 %v1684_v45  ;;  %v317_v16 = vld [vmem:[%s2826_s3 + $0xf0] sm:$0xff]  ;;  %v326_v19 = vld [vmem:[%s2826_s3 + $0x138] sm:$0xff]  ;;  %v300_v44 = vld [vmem:[%s2826_s3 + $0x68] sm:$0xff] }
  0x2e   : > { %1655 = vmatpush1.bf16.msra.mxu0 %v1654_v48  ;;  %v1686_v48 = vpack.c.bf16 %v285_v47, %v281_v46  ;;  %v2436_v17 = vpack.c.bf16 %v317_v16, %v313_v15  ;;  %v2444_v20 = vpack.c.bf16 %v326_v19, %v322_v18  ;;  %v321_v21 = vld [vmem:[%s2826_s3 + $0x110] sm:$0xff]  ;;  %v330_v24 = vld [vmem:[%s2826_s3 + $0x158] sm:$0xff]  ;;  %v2514_v46 = vpack.c.bf16 %v291_v42, %v287_v41  ;;  %v315_v9 = vld [vmem:[%s2826_s3 + $0xe0] sm:$0xff] }
  0x2f   : > { %1688 = vmatprep.subr.bf16.mxu0 %v2047_v50  ;;  %v325_v22 = vld [vmem:[%s2826_s3 + $0x130] sm:$0xff]  ;;  %v334_v25 = vld [vmem:[%s2826_s3 + $0x178] sm:$0xff]  ;;  %v320_v10 = vld [vmem:[%s2826_s3 + $0x108] sm:$0xff]  ;;  %v2570_v13 = vpack.c.bf16 %v315_v9, %v311_v6  ;;  %v354_v6 = vshrl.u32 %v353_v2, 7 }
  0x30   : > { %1687 = vmatpush1.bf16.msra.mxu1 %v1686_v48  ;;  %v2454_v23 = vpack.c.bf16 %v325_v22, %v321_v21  ;;  %v2462_v26 = vpack.c.bf16 %v334_v25, %v330_v24  ;;  %v329_v27 = vld [vmem:[%s2826_s3 + $0x150] sm:$0xff]  ;;  %v338_v30 = vld [vmem:[%s2826_s3 + $0x198] sm:$0xff]  ;;  %v2517_v48 = vpack.c.bf16 %v300_v44, %v296_v43  ;;  %v324_v12 = vld [vmem:[%s2826_s3 + $0x128] sm:$0xff] }
  0x31   : > { %438 = vmatmul.mubr.f32.vlgmr.msra.gmra.mrb[0].mxu0 %v2231_v49  ;;  %1691 = vmatprep.subr.bf16.mxu1 %v2047_v50  ;;  %v333_v28 = vld [vmem:[%s2826_s3 + $0x170] sm:$0xff]  ;;  %v342_v31 = vld [vmem:[%s2826_s3 + $0x1b8] sm:$0xff]  ;;  %v2573_v15 = vpack.c.bf16 %v324_v12, %v320_v10  ;;  %v319_v16 = vld [vmem:[%s2826_s3 + $0x100] sm:$0xff]  ;;  %v355_v9 = vsub.s32 0, %v354_v6  ;;  %v359_v12 = vsub.s32 1, %v354_v6 }
  0x32   : > { %1586 = vmatprep.mubr.msk.f32.mxu0 %vm2048_vm0, %v2046_v7  ;;  %v2472_v29 = vpack.c.bf16 %v333_v28, %v329_v27  ;;  %v346_v37 = vld [vmem:[%s2826_s3 + $0x1d8] sm:$0xff]  ;;  %v323_v18 = vld [vmem:[%s2826_s3 + $0x120] sm:$0xff]  ;;  %v328_v19 = vld [vmem:[%s2826_s3 + $0x148] sm:$0xff] }
  0x33   : > { %509 = vmatmul.mubr.f32.vlgmr.msra.gmra.mrb[0].mxu1 %v2231_v49  ;;  %v350_v38 = vld [vmem:[%s2826_s3 + $0x1f8] sm:$0xff]  ;;  %v332_v21 = vld [vmem:[%s2826_s3 + $0x168] sm:$0xff]  ;;  %v2588_v22 = vpack.c.bf16 %v323_v18, %v319_v16  ;;  %v327_v25 = vld [vmem:[%s2826_s3 + $0x140] sm:$0xff]  ;;  %v363_v18 = vsub.s32 2, %v354_v6 }
  0x34   : > { %1693 = vmatpush3.bf16.msra.mxu1 %v2243_v53  ;;  %1593 = vmatprep.mubr.msk.f32.mxu1 %vm2048_vm0, %v2046_v7  ;;  %v2498_v39 = vpack.c.bf16 %v350_v38, %v346_v37  ;;  %v2591_v24 = vpack.c.bf16 %v332_v21, %v328_v19  ;;  %v331_v27 = vld [vmem:[%s2826_s3 + $0x160] sm:$0xff]  ;;  %v336_v28 = vld [vmem:[%s2826_s3 + $0x188] sm:$0xff] }
  0x35   : > { %v339_v37 = vld [vmem:[%s2826_s3 + $0x1a0] sm:$0xff]  ;;  %v344_v38 = vld [vmem:[%s2826_s3 + $0x1c8] sm:$0xff] }
  0x36   : > { %v351_v10 = vld [vmem:[%s2827_s4] sm:$0xf] }
  0x37   : > { %1690 = vmatpush3.bf16.xpose.msra.mxu0 %v2243_v53  ;;  %v356_v16 = vrot.slane %v351_v10, %v355_v9  ;;  %v360_v19 = vrot.slane %v351_v10, %v359_v12 }
  0x3e   : > { %1587 = vmatmul.mubr.f32.vlgmr.msra.gmra.mrb[2].mxu0 %v2231_v49 }
  0x3f   : > { %807 = vmatprep.mubr.f32.mxu0 %v2046_v7 }
 0x104   : > { %v2248_v54 = vpop.f32.mrb[0].mxu0 }
 0x105   : > { %v2250_v55 = vpop.f32.mrb[1].mxu0  ;;  %v2664_v21 = vadd.f32 %v2248_v54, %v356_v16 }
 0x106   : > { %v510_v43 = vpop.f32.mrb[0].mxu1 }
 0x107   : > { %v512_v44 = vpop.f32.mrb[1].mxu1 }
 0x111   : > { %v582_v56 = vpop.f32.mrb[2].mxu0 }
 0x112   : > { %v1588_v57 = vpop.f32.mrb[3].mxu0  ;;  %v587_v58 = vsel %vm586_vm1, %v582_v56, -inf }
 0x113   : > { %588 = vmax.xlane.f32.xlu0 %v587_v58  ;;  %v2367_v57 = vpack.c.bf16 %v292_v52, %v288_v51  ;;  %v294_v58 = vld [vmem:[%s2826_s3 + $0x38] sm:$0xff]  ;;  %v295_v51 = vld [vmem:[%s2826_s3 + $0x40] sm:$0xff] }
 0x114   : > { %v299_v52 = vld [vmem:[%s2826_s3 + $0x60] sm:$0xff] }
 0x115   : > { %1695 = vmatprep.subr.bf16.mxu1 %v2367_v57 }
 0x1a0   : > { %v589_v32 = vpop.xlane.xlu0 %588 }
 0x1a1   : > { %v590_v33 = vsub.f32 %v582_v56, %v589_v32  ;;  %v290_v56 = vld [vmem:[%s2826_s3 + $0x18] sm:$0xff]  ;;  %v2481_v32 = vpack.c.bf16 %v342_v31, %v338_v30  ;;  %v340_v30 = vld [vmem:[%s2826_s3 + $0x1a8] sm:$0xff]  ;;  %v2606_v31 = vpack.c.bf16 %v331_v27, %v327_v25  ;;  %v364_v25 = vrot.slane %v351_v10, %v363_v18 }
 0x1a2   : > { %v2372_v59 = vpack.c.bf16 %v294_v58, %v290_v56  ;;  %v304_v56 = vld [vmem:[%s2826_s3 + $0x88] sm:$0xff]  ;;  %v367_v27 = vsub.s32 3, %v354_v6 }
 0x1a3   : > { %v591_v34 = vmul.f32 1.442695, %v590_v33  ;;  %v337_v33 = vld [vmem:[%s2826_s3 + $0x190] sm:$0xff]  ;;  %v308_v58 = vld [vmem:[%s2826_s3 + $0xa8] sm:$0xff] }
 0x1a4   : > { %1727 = vmatprep.subr.bf16.mxu0 %v2372_v59  ;;  %v2537_v60 = vpack.c.bf16 %v308_v58, %v304_v56  ;;  %v349_v56 = vld [vmem:[%s2826_s3 + $0x1f0] sm:$0xff] }
 0x1a5   : > { %1940 = vpow2.f32 %v591_v34  ;;  %1729 = vmatpush1.bf16.msra.mxu0 %v2381_v62  ;;  %v341_v34 = vld [vmem:[%s2826_s3 + $0x1b0] sm:$0xff] }
 0x1a6   : > { %1731 = vmatprep.subr.bf16.mxu0 %v2390_v1 }
 0x1a9   : > { %1733 = vmatpush1.bf16.msra.mxu0 %v2400_v4 }
 0x1aa   : > { %1735 = vmatprep.subr.bf16.mxu0 %v2408_v8 }
 0x1ad   : > { %1737 = vmatpush1.bf16.msra.mxu0 %v2418_v11 }
 0x1ae   : > { %1739 = vmatprep.subr.bf16.mxu0 %v2426_v14 }
 0x1af   : > { %v2325_v35 = vpop.eup %1940 }
 0x1b0   : > { %v593_v36 = vsel %vm586_vm1, %v2325_v35, 0.0 }
 0x1b1   : > { %594 = vadd.xlane.f32.xlu0 %v593_v36  ;;  %1741 = vmatpush1.bf16.msra.mxu0 %v2436_v17  ;;  %v2489_v36 = vpack.c.bf16 %v341_v34, %v337_v33  ;;  %v2609_v33 = vpack.c.bf16 %v340_v30, %v336_v28  ;;  %v335_v34 = vld [vmem:[%s2826_s3 + $0x180] sm:$0xff]  ;;  %v2667_v28 = vadd.f32 %v2250_v55, %v360_v19 }
 0x1b2   : > { %1743 = vmatprep.subr.bf16.mxu0 %v2444_v20  ;;  %v2624_v41 = vpack.c.bf16 %v339_v37, %v335_v34 }
 0x1b5   : > { %1745 = vmatpush1.bf16.msra.mxu0 %v2454_v23 }
 0x1b6   : > { %1747 = vmatprep.subr.bf16.mxu0 %v2462_v26 }
 0x1b9   : > { %1749 = vmatpush1.bf16.msra.mxu0 %v2472_v29 }
 0x1ba   : > { %1751 = vmatprep.subr.bf16.mxu0 %v2481_v32 }
 0x1bd   : > { %1753 = vmatpush1.bf16.msra.mxu0 %v2489_v36 }
 0x1be   : > { %1755 = vmatprep.subr.bf16.mxu0 %v2498_v39 }
 0x23e   : > { %v595_v40 = vpop.xlane.xlu0 %594 }
 0x23f   : > { %1942 = vrcp.f32 %v595_v40  ;;  %v348_v40 = vld [vmem:[%s2826_s3 + $0x1e8] sm:$0xff] }
 0x240   : > { %v2627_v42 = vpack.c.bf16 %v348_v40, %v344_v38 }
 0x249   : > { %v1943_v45 = vpop.eup %1942 }
 0x24a   : > { %v597_v47 = vmul.f32 %v1943_v45, %v2325_v35  ;;  %v2533_v35 = vpack.c.bf16 %v299_v52, %v295_v51  ;;  %v343_v45 = vld [vmem:[%s2826_s3 + $0x1c0] sm:$0xff]  ;;  %v345_v51 = vld [vmem:[%s2826_s3 + $0x1d0] sm:$0xff] }
 0x24b   : > { %v2645_v58 = vpack.c.bf16 %v349_v56, %v345_v51  ;;  %v368_v51 = vrot.slane %v351_v10, %v367_v27 }
 0x24c   : > { %1594 = vmatmul.mubr.msk.f32.vlgmr.msra.gmra.mrb[2].mxu1 %vm586_vm1, %v597_v47  ;;  %v347_v47 = vld [vmem:[%s2826_s3 + $0x1e0] sm:$0xff] }
 0x24d   : > { %1697 = vmatpush1.bf16.msra.mxu1 %v2514_v46  ;;  %736 = vmatprep.mubr.f32.mxu1 %v2046_v7  ;;  %v2640_v52 = vpack.c.bf16 %v347_v47, %v343_v45  ;;  %v2671_v47 = vadd.f32 %v510_v43, %v364_v25 }
 0x24e   : > { %1699 = vmatprep.subr.bf16.mxu1 %v2517_v48  ;;  %1757 = vmatpush1.bf16.msra.mxu0 %v2645_v58 }
 0x24f   : > { %1761 = vmatprep.subr.bf16.mxu0 %v2047_v50 }
 0x251   : > { %1701 = vmatpush1.bf16.msra.mxu1 %v2533_v35 }
 0x252   : > { %1703 = vmatprep.subr.bf16.mxu1 %v2537_v60 }
 0x255   : > { %1705 = vmatpush1.bf16.msra.mxu1 %v2552_v3 }
 0x256   : > { %1707 = vmatprep.subr.bf16.mxu1 %v2555_v5 }
 0x259   : > { %1709 = vmatpush1.bf16.msra.mxu1 %v2570_v13 }
 0x25a   : > { %1711 = vmatprep.subr.bf16.mxu1 %v2573_v15 }
 0x25d   : > { %1713 = vmatpush1.bf16.msra.mxu1 %v2588_v22 }
 0x25e   : > { %1715 = vmatprep.subr.bf16.mxu1 %v2591_v24 }
 0x261   : > { %1717 = vmatpush1.bf16.msra.mxu1 %v2606_v31 }
 0x262   : > { %1719 = vmatprep.subr.bf16.mxu1 %v2609_v33 }
 0x265   : > { %1721 = vmatpush1.bf16.msra.mxu1 %v2624_v41 }
 0x266   : > { %1723 = vmatprep.subr.bf16.mxu1 %v2627_v42 }
 0x269   : > { %1725 = vmatpush1.bf16.msra.mxu1 %v2640_v52 }
 0x26a   : > { %1758 = vmatprep.subr.bf16.mxu1 %v2047_v50 }
 0x31f   : > { %v667_v61 = vpop.f32.mrb[2].mxu1 }
 0x320   : > { %v671_v63 = vadd.f32 %v667_v61, %v2231_v49  ;;  %v1595_v0 = vpop.f32.mrb[3].mxu1 }
 0x322   : > { %737 = vmatmul.mubr.f32.vlgmr.msra.gmra.mrb[4].mxu1 %v671_v63  ;;  %808 = vmatmul.mubr.f32.vlgmr.msra.gmra.mrb[4].mxu0 %v671_v63  ;;  %v2674_v63 = vadd.f32 %v512_v44, %v368_v51 }
 0x323   : > { %1760 = vmatpush3.bf16.xpose.msra.mxu1 %v2243_v53  ;;  %1600 = vmatprep.mubr.msk.f32.mxu1 %vm2048_vm0, %v2046_v7 }
 0x324   : > { %1763 = vmatpush3.bf16.msra.mxu0 %v2243_v53  ;;  %1607 = vmatprep.mubr.msk.f32.mxu0 %vm2048_vm0, %v2046_v7 }
 0x325   : > { %1765 = vmatprep.subr.bf16.mxu0 %v2367_v57  ;;  %1797 = vmatprep.subr.bf16.mxu1 %v2372_v59 }
 0x3f5   : > { %v738_v30 = vpop.f32.mrb[4].mxu1  ;;  %v809_v34 = vpop.f32.mrb[4].mxu0 }
 0x3f6   : > { %v814_v37 = vadd.f32 %v738_v30, %v2664_v21  ;;  %v740_v38 = vpop.f32.mrb[5].mxu1  ;;  %v811_v40 = vpop.f32.mrb[5].mxu0  ;;  %v816_v54 = vadd.f32 %v809_v34, %v2671_v47 }
 0x3f7   : > { %v815_v45 = vadd.f32 %v740_v38, %v2667_v28  ;;  %v817_v55 = vadd.f32 %v811_v40, %v2674_v63 }
 0x3f8   : > { %v818_v56 = vmul.f32 0.5, %v814_v37 }
 0x3f9   : > { %v822_v61 = vmul.f32 0.5, %v815_v45  ;;  %v827_v0 = vmul.f32 0.5, %v817_v55 }
 0x3fa   : > { %1944 = vtanh.f32 %v818_v56 }
 0x3fb   : > { %1946 = vtanh.f32 %v822_v61 }
 0x3fc   : > { %1948 = vtanh.f32 %v816_v54 }
 0x3fd   : > { %1950 = vtanh.f32 %v827_v0 }
 0x404   : > { %v1945_v2 = vpop.eup %1944 }
 0x405   : > { %v1947_v6 = vpop.eup %1946  ;;  %v820_v9 = vadd.f32 1.0, %v1945_v2 }
 0x406   : > { %v824_v12 = vadd.f32 1.0, %v1947_v6  ;;  %v1949_v16 = vpop.eup %1948 }
 0x407   : > { %v821_v43 = vmul.f32 0.5, %v820_v9  ;;  %v1951_v44 = vpop.eup %1950 }
 0x408   : > { %v825_v10 = vmul.f32 0.5, %v824_v12  ;;  %v829_v27 = vadd.f32 1.0, %v1951_v44 }
 0x409   : > { %v832_v18 = vmul.f32 %v1949_v16, %v821_v43 }
 0x40a   : > { %v831_v19 = vmul.f32 0.0, %v825_v10  ;;  %v830_v30 = vmul.f32 0.5, %v829_v27 }
 0x40c   : > { %v2677_v25 = vadd.f32 %v832_v18, %v831_v19 }
 0x40e   : > { %1952 = vtanh.f32 %v2677_v25 }
 0x418   : > { %v1953_v34 = vpop.eup %1952 }
 0x419   : > { %v835_v37 = vmul.f32 %v1953_v34, %v830_v30 }
 0x41b   : > { %v836_v38 = vadd.f32 %v835_v37, %v2231_v49 }
 0x41d   : > { %1601 = vmatmul.mubr.f32.vlgmr.msra.gmra.mrb[6].mxu1 %v836_v38 }
 0x41e   : > { %1799 = vmatpush1.bf16.msra.mxu1 %v2381_v62  ;;  %1127 = vmatprep.mubr.f32.mxu1 %v2046_v7 }
 0x41f   : > { %1801 = vmatprep.subr.bf16.mxu1 %v2390_v1 }
 0x422   : > { %1803 = vmatpush1.bf16.msra.mxu1 %v2400_v4 }
 0x423   : > { %1805 = vmatprep.subr.bf16.mxu1 %v2408_v8 }
 0x426   : > { %1807 = vmatpush1.bf16.msra.mxu1 %v2418_v11 }
 0x427   : > { %1809 = vmatprep.subr.bf16.mxu1 %v2426_v14 }
 0x42a   : > { %1811 = vmatpush1.bf16.msra.mxu1 %v2436_v17 }
 0x42b   : > { %1813 = vmatprep.subr.bf16.mxu1 %v2444_v20 }
 0x42e   : > { %1815 = vmatpush1.bf16.msra.mxu1 %v2454_v23 }
 0x42f   : > { %1817 = vmatprep.subr.bf16.mxu1 %v2462_v26 }
 0x432   : > { %1819 = vmatpush1.bf16.msra.mxu1 %v2472_v29 }
 0x433   : > { %1821 = vmatprep.subr.bf16.mxu1 %v2481_v32 }
 0x436   : > { %1823 = vmatpush1.bf16.msra.mxu1 %v2489_v36 }
 0x437   : > { %1825 = vmatprep.subr.bf16.mxu1 %v2498_v39 }
 0x43a   : > { %1827 = vmatpush1.bf16.msra.mxu1 %v2645_v58 }
 0x43b   : > { %1831 = vmatprep.subr.bf16.mxu1 %v2047_v50 }
 0x4f0   : > { %v903_v40 = vpop.f32.mrb[6].mxu1 }
 0x4f1   : > { %v1602_v45 = vpop.f32.mrb[7].mxu1  ;;  %v907_v51 = vsel %vm586_vm1, %v903_v40, -inf }
 0x4f2   : > { %908 = vmax.xlane.f32.xlu1 %v907_v51 }
 0x57f   : > { %v909_v56 = vpop.xlane.xlu1 %908 }
 0x580   : > { %v910_v61 = vsub.f32 %v903_v40, %v909_v56 }
 0x582   : > { %v911_v54 = vmul.f32 1.442695, %v910_v61 }
 0x584   : > { %1954 = vpow2.f32 %v911_v54 }
 0x58e   : > { %v1955_v55 = vpop.eup %1954 }
 0x58f   : > { %v913_v0 = vsel %vm586_vm1, %v1955_v55, 0.0 }
 0x590   : > { %914 = vadd.xlane.f32.xlu1 %v913_v0 }
 0x61d   : > { %v915_v2 = vpop.xlane.xlu1 %914 }
 0x61e   : > { %1956 = vrcp.f32 %v915_v2 }
 0x628   : > { %v1957_v6 = vpop.eup %1956 }
 0x629   : > { %v917_v9 = vmul.f32 %v1957_v6, %v1955_v55 }
 0x62b   : > { %1608 = vmatmul.mubr.msk.f32.vlgmr.msra.gmra.mrb[6].mxu0 %vm586_vm1, %v917_v9 }
 0x62c   : > { %1767 = vmatpush1.bf16.msra.mxu0 %v2514_v46  ;;  %1056 = vmatprep.mubr.f32.mxu0 %v2046_v7 }
 0x62d   : > { %1769 = vmatprep.subr.bf16.mxu0 %v2517_v48 }
 0x630   : > { %1771 = vmatpush1.bf16.msra.mxu0 %v2533_v35 }
 0x631   : > { %1773 = vmatprep.subr.bf16.mxu0 %v2537_v60 }
 0x634   : > { %1775 = vmatpush1.bf16.msra.mxu0 %v2552_v3 }
 0x635   : > { %1777 = vmatprep.subr.bf16.mxu0 %v2555_v5 }
 0x638   : > { %1779 = vmatpush1.bf16.msra.mxu0 %v2570_v13 }
 0x639   : > { %1781 = vmatprep.subr.bf16.mxu0 %v2573_v15 }
 0x63c   : > { %1783 = vmatpush1.bf16.msra.mxu0 %v2588_v22 }
 0x63d   : > { %1785 = vmatprep.subr.bf16.mxu0 %v2591_v24 }
 0x640   : > { %1787 = vmatpush1.bf16.msra.mxu0 %v2606_v31 }
 0x641   : > { %1789 = vmatprep.subr.bf16.mxu0 %v2609_v33 }
 0x644   : > { %1791 = vmatpush1.bf16.msra.mxu0 %v2624_v41 }
 0x645   : > { %1793 = vmatprep.subr.bf16.mxu0 %v2627_v42 }
 0x648   : > { %1795 = vmatpush1.bf16.msra.mxu0 %v2640_v52 }
 0x649   : > { %1828 = vmatprep.subr.bf16.mxu0 %v2047_v50 }
 0x6fe   : > { %v987_v12 = vpop.f32.mrb[6].mxu0 }
 0x6ff   : > { %v991_v43 = vadd.f32 %v987_v12, %v836_v38  ;;  %v1609_v16 = vpop.f32.mrb[7].mxu0 }
 0x701   : > { %1057 = vmatmul.mubr.f32.vlgmr.msra.gmra.mrb[8].mxu0 %v991_v43  ;;  %1128 = vmatmul.mubr.f32.vlgmr.msra.gmra.mrb[8].mxu1 %v991_v43 }
 0x702   : > { %1830 = vmatpush3.bf16.xpose.msra.mxu0 %v2243_v53  ;;  %1614 = vmatprep.mubr.msk.f32.mxu0 %vm2048_vm0, %v2046_v7 }
 0x703   : > { %1833 = vmatpush3.bf16.msra.mxu1 %v2243_v53  ;;  %1621 = vmatprep.mubr.msk.f32.mxu1 %vm2048_vm0, %v2046_v7 }
 0x704   : > { %1835 = vmatprep.subr.bf16.mxu1 %v2367_v57  ;;  %1867 = vmatprep.subr.bf16.mxu0 %v2372_v59 }
 0x7d4   : > { %v1058_v50 = vpop.f32.mrb[8].mxu0  ;;  %v1129_v10 = vpop.f32.mrb[8].mxu1 }
 0x7d5   : > { %v1134_v18 = vadd.f32 %v1058_v50, %v2664_v21  ;;  %v1060_v19 = vpop.f32.mrb[9].mxu0  ;;  %v1131_v44 = vpop.f32.mrb[9].mxu1  ;;  %v1136_v53 = vadd.f32 %v1129_v10, %v2671_v47 }
 0x7d6   : > { %v1135_v27 = vadd.f32 %v1060_v19, %v2667_v28  ;;  %v1137_v37 = vadd.f32 %v1131_v44, %v2674_v63 }
 0x7d7   : > { %v1138_v30 = vmul.f32 0.5, %v1134_v18 }
 0x7d8   : > { %v1142_v34 = vmul.f32 0.5, %v1135_v27  ;;  %v1147_v57 = vmul.f32 0.5, %v1137_v37 }
 0x7d9   : > { %1958 = vtanh.f32 %v1138_v30 }
 0x7da   : > { %1960 = vtanh.f32 %v1142_v34 }
 0x7db   : > { %1962 = vtanh.f32 %v1136_v53 }
 0x7dc   : > { %1964 = vtanh.f32 %v1147_v57 }
 0x7e3   : > { %v1959_v38 = vpop.eup %1958 }
 0x7e4   : > { %v1961_v59 = vpop.eup %1960  ;;  %v1140_v40 = vadd.f32 1.0, %v1959_v38 }
 0x7e5   : > { %v1144_v45 = vadd.f32 1.0, %v1961_v59  ;;  %v1963_v56 = vpop.eup %1962 }
 0x7e6   : > { %v1141_v51 = vmul.f32 0.5, %v1140_v40  ;;  %v1965_v2 = vpop.eup %1964 }
 0x7e7   : > { %v1145_v61 = vmul.f32 0.5, %v1144_v45  ;;  %v1149_v6 = vadd.f32 1.0, %v1965_v2 }
 0x7e8   : > { %v1152_v54 = vmul.f32 %v1963_v56, %v1141_v51 }
 0x7e9   : > { %v1151_v55 = vmul.f32 %v1145_v61, %v2677_v25  ;;  %v1150_v9 = vmul.f32 0.5, %v1149_v6 }
 0x7eb   : > { %v2731_v0 = vadd.f32 %v1152_v54, %v1151_v55 }
 0x7ed   : > { %1966 = vtanh.f32 %v2731_v0 }
 0x7f7   : > { %v1967_v12 = vpop.eup %1966 }
 0x7f8   : > { %v1155_v43 = vmul.f32 %v1967_v12, %v1150_v9 }
 0x7fa   : > { %v1156_v16 = vadd.f32 %v1155_v43, %v2231_v49 }
 0x7fc   : > { %1615 = vmatmul.mubr.f32.vlgmr.msra.gmra.mrb[10].mxu0 %v1156_v16 }
 0x7fd   : > { %1869 = vmatpush1.bf16.msra.mxu0 %v2381_v62  ;;  %1447 = vmatprep.mubr.f32.mxu0 %v2046_v7 }
 0x7fe   : > { %1871 = vmatprep.subr.bf16.mxu0 %v2390_v1 }
 0x801   : > { %1873 = vmatpush1.bf16.msra.mxu0 %v2400_v4 }
 0x802   : > { %1875 = vmatprep.subr.bf16.mxu0 %v2408_v8 }
 0x805   : > { %1877 = vmatpush1.bf16.msra.mxu0 %v2418_v11 }
 0x806   : > { %1879 = vmatprep.subr.bf16.mxu0 %v2426_v14 }
 0x809   : > { %1881 = vmatpush1.bf16.msra.mxu0 %v2436_v17 }
 0x80a   : > { %1883 = vmatprep.subr.bf16.mxu0 %v2444_v20 }
 0x80d   : > { %1885 = vmatpush1.bf16.msra.mxu0 %v2454_v23 }
 0x80e   : > { %1887 = vmatprep.subr.bf16.mxu0 %v2462_v26 }
 0x811   : > { %1889 = vmatpush1.bf16.msra.mxu0 %v2472_v29 }
 0x812   : > { %1891 = vmatprep.subr.bf16.mxu0 %v2481_v32 }
 0x815   : > { %1893 = vmatpush1.bf16.msra.mxu0 %v2489_v36 }
 0x816   : > { %1895 = vmatprep.subr.bf16.mxu0 %v2498_v39 }
 0x819   : > { %1897 = vmatpush1.bf16.msra.mxu0 %v2645_v58 }
 0x8cf   : > { %v1223_v62 = vpop.f32.mrb[10].mxu0 }
 0x8d0   : > { %v1616_v1 = vpop.f32.mrb[11].mxu0  ;;  %v1227_v4 = vsel %vm586_vm1, %v1223_v62, -inf }
 0x8d1   : > { %1228 = vmax.xlane.f32.xlu0 %v1227_v4 }
 0x95e   : > { %v1229_v8 = vpop.xlane.xlu0 %1228 }
 0x95f   : > { %v1230_v11 = vsub.f32 %v1223_v62, %v1229_v8 }
 0x961   : > { %v1231_v14 = vmul.f32 1.442695, %v1230_v11 }
 0x963   : > { %1968 = vpow2.f32 %v1231_v14 }
 0x96d   : > { %v1969_v17 = vpop.eup %1968 }
 0x96e   : > { %v1233_v20 = vsel %vm586_vm1, %v1969_v17, 0.0 }
 0x96f   : > { %1234 = vadd.xlane.f32.xlu1 %v1233_v20 }
 0x9fc   : > { %v1235_v23 = vpop.xlane.xlu1 %1234 }
 0x9fd   : > { %1970 = vrcp.f32 %v1235_v23 }
 0xa07   : > { %v1971_v26 = vpop.eup %1970 }
 0xa08   : > { %v1237_v29 = vmul.f32 %v1971_v26, %v1969_v17 }
 0xa0a   : > { %1622 = vmatmul.mubr.msk.f32.vlgmr.msra.gmra.mrb[10].mxu1 %vm586_vm1, %v1237_v29 }
 0xa0b   : > { %1837 = vmatpush1.bf16.msra.mxu1 %v2514_v46  ;;  %1376 = vmatprep.mubr.f32.mxu1 %v2046_v7 }
 0xa0c   : > { %1839 = vmatprep.subr.bf16.mxu1 %v2517_v48 }
 0xa0f   : > { %1841 = vmatpush1.bf16.msra.mxu1 %v2533_v35 }
 0xa10   : > { %1843 = vmatprep.subr.bf16.mxu1 %v2537_v60 }
 0xa13   : > { %1845 = vmatpush1.bf16.msra.mxu1 %v2552_v3 }
 0xa14   : > { %1847 = vmatprep.subr.bf16.mxu1 %v2555_v5 }
 0xa17   : > { %1849 = vmatpush1.bf16.msra.mxu1 %v2570_v13 }
 0xa18   : > { %1851 = vmatprep.subr.bf16.mxu1 %v2573_v15 }
 0xa1b   : > { %1853 = vmatpush1.bf16.msra.mxu1 %v2588_v22 }
 0xa1c   : > { %1855 = vmatprep.subr.bf16.mxu1 %v2591_v24 }
 0xa1f   : > { %1857 = vmatpush1.bf16.msra.mxu1 %v2606_v31 }
 0xa20   : > { %1859 = vmatprep.subr.bf16.mxu1 %v2609_v33 }
 0xa23   : > { %1861 = vmatpush1.bf16.msra.mxu1 %v2624_v41 }
 0xa24   : > { %1863 = vmatprep.subr.bf16.mxu1 %v2627_v42 }
 0xa27   : > { %1865 = vmatpush1.bf16.msra.mxu1 %v2640_v52 }
 0xadd   : > { %v1307_v7 = vpop.f32.mrb[10].mxu1 }
 0xade   : > { %v1311_v32 = vadd.f32 %v1307_v7, %v1156_v16  ;;  %v1623_v36 = vpop.f32.mrb[11].mxu1 }
 0xae0   : > { %1377 = vmatmul.mubr.f32.vlgmr.msra.gmra.mrb[12].mxu1 %v1311_v32  ;;  %1448 = vmatmul.mubr.f32.vlgmr.msra.gmra.mrb[12].mxu0 %v1311_v32 }
 0xbb3   : > { %v1378_v39 = vpop.f32.mrb[12].mxu1  ;;  %v1449_v46 = vpop.f32.mrb[12].mxu0 }
 0xbb4   : > { %v1454_v48 = vadd.f32 %v1378_v39, %v2664_v21  ;;  %v1380_v35 = vpop.f32.mrb[13].mxu1  ;;  %v1451_v60 = vpop.f32.mrb[13].mxu0  ;;  %v1456_v15 = vadd.f32 %v1449_v46, %v2671_v47 }
 0xbb5   : > { %v1455_v3 = vadd.f32 %v1380_v35, %v2667_v28  ;;  %v1457_v22 = vadd.f32 %v1451_v60, %v2674_v63 }
 0xbb6   : > { %v1458_v5 = vmul.f32 0.5, %v1454_v48 }
 0xbb7   : > { %v1462_v13 = vmul.f32 0.5, %v1455_v3  ;;  %v1467_v24 = vmul.f32 0.5, %v1457_v22 }
 0xbb8   : > { %1972 = vtanh.f32 %v1458_v5 }
 0xbb9   : > { %1974 = vtanh.f32 %v1462_v13 }
 0xbba   : > { %1976 = vtanh.f32 %v1456_v15 }
 0xbbb   : > { %1978 = vtanh.f32 %v1467_v24 }
 0xbc2   : > { %v1973_v31 = vpop.eup %1972 }
 0xbc3   : > { %v1975_v33 = vpop.eup %1974  ;;  %v1460_v41 = vadd.f32 1.0, %v1973_v31 }
 0xbc4   : > { %v1464_v42 = vadd.f32 1.0, %v1975_v33  ;;  %v1977_v58 = vpop.eup %1976 }
 0xbc5   : > { %v1461_v52 = vmul.f32 0.5, %v1460_v41  ;;  %v1979_v47 = vpop.eup %1978 }
 0xbc6   : > { %v1465_v21 = vmul.f32 0.5, %v1464_v42  ;;  %v1469_v63 = vadd.f32 1.0, %v1979_v47 }
 0xbc7   : > { %v1472_v28 = vmul.f32 %v1977_v58, %v1461_v52 }
 0xbc8   : > { %v1471_v25 = vmul.f32 %v1465_v21, %v2731_v0  ;;  %v1470_v10 = vmul.f32 0.5, %v1469_v63 }
 0xbca   : > { %v1473_v50 = vadd.f32 %v1472_v28, %v1471_v25 }
 0xbcc   : > { %1980 = vtanh.f32 %v1473_v50 }
 0xbd6   : > { %v1981_v18 = vpop.eup %1980 }
 0xbd7   : > { %v1475_v19 = vmul.f32 %v1981_v18, %v1470_v10 }
 0xbd9   : > { %v1476_v44 = vadd.f32 %v1475_v19, %v2231_v49 }
 0xbdb   : > { %1477 = vst [vmem:[%s215_s25] sm:$0xff] %v1476_v44 }
 0xbdc   : > { %1995 = shalt.err (!%p1992_p3)
}
 0xbdd   : > { %s1996_s12 = scalar_lea.hbm %s2781_s7, 128  ;;  %s2000_s15 = scalar_lea.hbm %s2828_s5, 256 }
 0xbde   : > { %p1997_p4 = scmp.ne.s32.totalorder %s2781_s7, %s1996_s12  ;;  %p2001_p9 = scmp.lt.u32.totalorder %s2781_s7, %s2828_s5 }
 0xbdf   : > { %p2002_p10 = scmp.lt.u32.totalorder %s2000_s15, %s1996_s12  ;;  %p2004_p12 = scmp.lt.u32.totalorder %s1996_s12, %s2781_s7 }
 0xbe0   : > { %p1998_p7 = pnand %p1997_p4, %p2118_p5 }
 0xbe1   : > { %p2003_p11 = por %p2002_p10, %p2001_p9 }
 0xbe2   : > { %p1999_p8 = pneg %p1998_p7 }
 0xbe3   : > { %p2005_p13 = por %p2004_p12, %p2003_p11 }
 0xbe5   : > { %p2006_p0 = pnand %p2005_p13, %p1999_p8 }
 0xbe7   : > { %2009 = shalt.err (!%p2006_p0)
}
 0xbe8   : > { %1898 = dma.vmem_to_hbm [thread:$0]  (%p2118_p5), %s2783_s26, 128, %s2781_s7, %s1479_s8  }
 0xbe9 PF: > { %p1904_p1 = scmp.ge.s32.totalorder %s2044_s21, 2  ;;  %s1504_s23 = sand.u32 1, %s2032_s18  }
 0xbea   : > { %s1505_s25 = scalar_lea.sflag [#allocation3], %s1504_s23 }
 0xbeb   : > { %p1901_p2 = pnand %p1904_p1, %p2122_p6 }
 0xbed   : > { %2027 = dma.done.wait (!%p1901_p2), %s1505_s25, 128  }
 0xbee   : > { %2029 = vsyncadd (!%p1901_p2), %s1505_s25, 4294967168  ;;  %p15_p3 = scmp.ge.s32.totalorder %s2105_s24, 4   ;;  %s2831_s18 = smov %s2036_s19 }
 0xbef   : > { %s2832_s19 = smov %s2040_s20  ;;  %s2833_s20 = smov %s2116_s27 }
 0xbf0   : > { %s2834_s21 = smov %s2105_s24  ;;  %17 = sbr.rel (!%p15_p3) target bundleno = 3 (0x3), region = 75 }
 0xbf7   :  { %1510 = vsyncpa [#allocation3], 1 }
 0xbf8   :  { %1512 = vsyncpa [#allocation3 + $0x1], 1 }

</bundles_post_ra>
